<compile_context>
chip_gen: v7x
topology: tpu7x:2x2x1
jax: 0.10.0
libtpu: 0.0.40
codegen_flags: <defaults>
</compile_context>

<pallas_src>
import jax
import jax.numpy as jnp
from jax import lax
from jax.experimental import pallas as pl
from jax.experimental.pallas import tpu as pltpu

# ---------------- config (small, consistent with the module) ----------------
VOCAB_SIZE = 16   # vocab_size
MAX_LEN    = 16   # max_len
D_MODEL    = 32   # d_model
BATCH      = 2
SEQ_LEN    = 8
LN_EPS     = 1e-5


def _embedding_kernel(ids_ref, tok_ref, pos_ref, gb_ref, out_ref):
    ids = ids_ref[...]                      # [N, 1] int32
    tok = tok_ref[...]                      # [V, D] f32 (whole table: < 1 vreg)
    V, D = tok.shape

    # Start from the (pre-tiled) positional embedding, then accumulate the
    # token embedding with a pure-VPU gather: for each of the V (=16) table
    # rows, select it into the rows whose id matches.  No MXU involvement.
    e = pos_ref[...]                                           # [N, D] f32
    for v in range(V):
        sel = (ids == v).astype(jnp.float32)                   # [N, 1]
        e = e + sel * tok[v:v + 1, :]                          # [N,1]*[1,D] -> [N,D]

    # Single-pass LayerNorm statistics over d_model.
    inv_d = jnp.float32(1.0 / D)
    s  = jnp.sum(e, axis=-1, keepdims=True)                    # [N, 1]
    s2 = jnp.sum(e * e, axis=-1, keepdims=True)                # [N, 1]
    mean = s * inv_d
    var = jnp.maximum(s2 * inv_d - mean * mean, 0.0)
    inv_std = lax.rsqrt(var + LN_EPS)                          # EUP

    gamma = gb_ref[0:1, :]                                     # [1, D]
    beta  = gb_ref[1:2, :]                                     # [1, D]
    out_ref[...] = ((e - mean) * inv_std * gamma + beta).astype(out_ref.dtype)


def embedding_forward(x_ids, tok_table, pos_table, gamma, beta):
    B, S = x_ids.shape
    V, D = tok_table.shape
    N = B * S

    # Flatten ids in the wrapper (no in-kernel reshape needed).
    ids_flat = x_ids.reshape(N, 1).astype(jnp.int32)           # [N, 1]
    # Positions are compile-time static: row (b, s) uses pos_table[s].
    # Tile once on the host side so the kernel only does a broadcast add.
    pos_flat = jnp.tile(pos_table[:S], (B, 1))                 # [N, D]
    # Pack LayerNorm affine params into one array (fewer kernel inputs).
    gb = jnp.stack([gamma, beta], axis=0)                      # [2, D]

    vmem = pl.BlockSpec(memory_space=pltpu.MemorySpace.VMEM)
    out_flat = pl.pallas_call(
        _embedding_kernel,
        out_shape=jax.ShapeDtypeStruct((N, D), jnp.float32),
        in_specs=[vmem, vmem, vmem, vmem],
        out_specs=vmem,
    )(ids_flat, tok_table, pos_flat, gb)

    return out_flat.reshape(B, S, D)


def _reference(x_ids, tok_table, pos_table, gamma, beta):
    S = x_ids.shape[1]
    tok = tok_table[x_ids]                           # [B, S, D]
    pos = pos_table[jnp.arange(S)][None, :, :]       # [1, S, D]
    e = tok + pos
    mean = jnp.mean(e, axis=-1, keepdims=True)
    var = jnp.mean((e - mean) ** 2, axis=-1, keepdims=True)
    return (e - mean) * lax.rsqrt(var + LN_EPS) * gamma + beta


if __name__ == "__main__":
    key = jax.random.PRNGKey(0)
    k_ids, k_tok, k_pos = jax.random.split(key, 3)

    x_ids = jax.random.randint(k_ids, (BATCH, SEQ_LEN), 0, VOCAB_SIZE,
                               dtype=jnp.int32)
    # nn.Embedding default init: N(0, 1); nn.LayerNorm default: ones / zeros.
    tok_table = jax.random.normal(k_tok, (VOCAB_SIZE, D_MODEL), jnp.float32)
    pos_table = jax.random.normal(k_pos, (MAX_LEN, D_MODEL), jnp.float32)
    gamma = jnp.ones((D_MODEL,), jnp.float32)
    beta = jnp.zeros((D_MODEL,), jnp.float32)

    out = embedding_forward(x_ids, tok_table, pos_table, gamma, beta)
    out = jax.block_until_ready(out)

    ref = _reference(x_ids, tok_table, pos_table, gamma, beta)
    assert out.shape == (BATCH, SEQ_LEN, D_MODEL)
    assert jnp.allclose(out, ref, atol=1e-4, rtol=1e-4)

    print("KERNEL_OK")
</pallas_src>

<mosaic_0001>
module attributes {stable_mosaic.version = 11 : i64} {
  func.func @_embedding_kernel(%arg0: memref<16x1xi32, #tpu.memory_space<vmem>>, %arg1: memref<16x32xf32, #tpu.memory_space<vmem>>, %arg2: memref<16x32xf32, #tpu.memory_space<vmem>>, %arg3: memref<2x32xf32, #tpu.memory_space<vmem>>, %arg4: memref<16x32xf32, #tpu.memory_space<vmem>>) attributes {dimension_semantics = [], scalar_prefetch = 0 : i64, scratch_operands = 0 : i64, tpu.core_type = #tpu.core_type<tc>} {
    %c0 = arith.constant 0 : index
    %c0_0 = arith.constant 0 : index
    %0 = vector.load %arg0[%c0, %c0_0] : memref<16x1xi32, #tpu.memory_space<vmem>>, vector<16x1xi32>
    %c0_1 = arith.constant 0 : index
    %c0_2 = arith.constant 0 : index
    %1 = vector.load %arg1[%c0_1, %c0_2] : memref<16x32xf32, #tpu.memory_space<vmem>>, vector<16x32xf32>
    %c0_3 = arith.constant 0 : index
    %c0_4 = arith.constant 0 : index
    %2 = vector.load %arg2[%c0_3, %c0_4] : memref<16x32xf32, #tpu.memory_space<vmem>>, vector<16x32xf32>
    %c0_i32 = arith.constant 0 : i32
    %3 = vector.broadcast %c0_i32 : i32 to vector<16x1xi32>
    %4 = arith.cmpi eq, %0, %3 : vector<16x1xi32>
    %5 = arith.extui %4 : vector<16x1xi1> to vector<16x1xi32>
    %6 = arith.sitofp %5 : vector<16x1xi32> to vector<16x1xf32>
    %7 = vector.extract_strided_slice %1 {offsets = [0, 0], sizes = [1, 32], strides = [1, 1]} : vector<16x32xf32> to vector<1x32xf32>
    %8 = vector.broadcast %6 : vector<16x1xf32> to vector<16x32xf32>
    %9 = vector.broadcast %7 : vector<1x32xf32> to vector<16x32xf32>
    %10 = arith.mulf %8, %9 : vector<16x32xf32>
    %11 = arith.addf %2, %10 : vector<16x32xf32>
    %c1_i32 = arith.constant 1 : i32
    %12 = vector.broadcast %c1_i32 : i32 to vector<16x1xi32>
    %13 = arith.cmpi eq, %0, %12 : vector<16x1xi32>
    %14 = arith.extui %13 : vector<16x1xi1> to vector<16x1xi32>
    %15 = arith.sitofp %14 : vector<16x1xi32> to vector<16x1xf32>
    %16 = vector.extract_strided_slice %1 {offsets = [1, 0], sizes = [1, 32], strides = [1, 1]} : vector<16x32xf32> to vector<1x32xf32>
    %17 = vector.broadcast %15 : vector<16x1xf32> to vector<16x32xf32>
    %18 = vector.broadcast %16 : vector<1x32xf32> to vector<16x32xf32>
    %19 = arith.mulf %17, %18 : vector<16x32xf32>
    %20 = arith.addf %11, %19 : vector<16x32xf32>
    %c2_i32 = arith.constant 2 : i32
    %21 = vector.broadcast %c2_i32 : i32 to vector<16x1xi32>
    %22 = arith.cmpi eq, %0, %21 : vector<16x1xi32>
    %23 = arith.extui %22 : vector<16x1xi1> to vector<16x1xi32>
    %24 = arith.sitofp %23 : vector<16x1xi32> to vector<16x1xf32>
    %25 = vector.extract_strided_slice %1 {offsets = [2, 0], sizes = [1, 32], strides = [1, 1]} : vector<16x32xf32> to vector<1x32xf32>
    %26 = vector.broadcast %24 : vector<16x1xf32> to vector<16x32xf32>
    %27 = vector.broadcast %25 : vector<1x32xf32> to vector<16x32xf32>
    %28 = arith.mulf %26, %27 : vector<16x32xf32>
    %29 = arith.addf %20, %28 : vector<16x32xf32>
    %c3_i32 = arith.constant 3 : i32
    %30 = vector.broadcast %c3_i32 : i32 to vector<16x1xi32>
    %31 = arith.cmpi eq, %0, %30 : vector<16x1xi32>
    %32 = arith.extui %31 : vector<16x1xi1> to vector<16x1xi32>
    %33 = arith.sitofp %32 : vector<16x1xi32> to vector<16x1xf32>
    %34 = vector.extract_strided_slice %1 {offsets = [3, 0], sizes = [1, 32], strides = [1, 1]} : vector<16x32xf32> to vector<1x32xf32>
    %35 = vector.broadcast %33 : vector<16x1xf32> to vector<16x32xf32>
    %36 = vector.broadcast %34 : vector<1x32xf32> to vector<16x32xf32>
    %37 = arith.mulf %35, %36 : vector<16x32xf32>
    %38 = arith.addf %29, %37 : vector<16x32xf32>
    %c4_i32 = arith.constant 4 : i32
    %39 = vector.broadcast %c4_i32 : i32 to vector<16x1xi32>
    %40 = arith.cmpi eq, %0, %39 : vector<16x1xi32>
    %41 = arith.extui %40 : vector<16x1xi1> to vector<16x1xi32>
    %42 = arith.sitofp %41 : vector<16x1xi32> to vector<16x1xf32>
    %43 = vector.extract_strided_slice %1 {offsets = [4, 0], sizes = [1, 32], strides = [1, 1]} : vector<16x32xf32> to vector<1x32xf32>
    %44 = vector.broadcast %42 : vector<16x1xf32> to vector<16x32xf32>
    %45 = vector.broadcast %43 : vector<1x32xf32> to vector<16x32xf32>
    %46 = arith.mulf %44, %45 : vector<16x32xf32>
    %47 = arith.addf %38, %46 : vector<16x32xf32>
    %c5_i32 = arith.constant 5 : i32
    %48 = vector.broadcast %c5_i32 : i32 to vector<16x1xi32>
    %49 = arith.cmpi eq, %0, %48 : vector<16x1xi32>
    %50 = arith.extui %49 : vector<16x1xi1> to vector<16x1xi32>
    %51 = arith.sitofp %50 : vector<16x1xi32> to vector<16x1xf32>
    %52 = vector.extract_strided_slice %1 {offsets = [5, 0], sizes = [1, 32], strides = [1, 1]} : vector<16x32xf32> to vector<1x32xf32>
    %53 = vector.broadcast %51 : vector<16x1xf32> to vector<16x32xf32>
    %54 = vector.broadcast %52 : vector<1x32xf32> to vector<16x32xf32>
    %55 = arith.mulf %53, %54 : vector<16x32xf32>
    %56 = arith.addf %47, %55 : vector<16x32xf32>
    %c6_i32 = arith.constant 6 : i32
    %57 = vector.broadcast %c6_i32 : i32 to vector<16x1xi32>
    %58 = arith.cmpi eq, %0, %57 : vector<16x1xi32>
    %59 = arith.extui %58 : vector<16x1xi1> to vector<16x1xi32>
    %60 = arith.sitofp %59 : vector<16x1xi32> to vector<16x1xf32>
    %61 = vector.extract_strided_slice %1 {offsets = [6, 0], sizes = [1, 32], strides = [1, 1]} : vector<16x32xf32> to vector<1x32xf32>
    %62 = vector.broadcast %60 : vector<16x1xf32> to vector<16x32xf32>
    %63 = vector.broadcast %61 : vector<1x32xf32> to vector<16x32xf32>
    %64 = arith.mulf %62, %63 : vector<16x32xf32>
    %65 = arith.addf %56, %64 : vector<16x32xf32>
    %c7_i32 = arith.constant 7 : i32
    %66 = vector.broadcast %c7_i32 : i32 to vector<16x1xi32>
    %67 = arith.cmpi eq, %0, %66 : vector<16x1xi32>
    %68 = arith.extui %67 : vector<16x1xi1> to vector<16x1xi32>
    %69 = arith.sitofp %68 : vector<16x1xi32> to vector<16x1xf32>
    %70 = vector.extract_strided_slice %1 {offsets = [7, 0], sizes = [1, 32], strides = [1, 1]} : vector<16x32xf32> to vector<1x32xf32>
    %71 = vector.broadcast %69 : vector<16x1xf32> to vector<16x32xf32>
    %72 = vector.broadcast %70 : vector<1x32xf32> to vector<16x32xf32>
    %73 = arith.mulf %71, %72 : vector<16x32xf32>
    %74 = arith.addf %65, %73 : vector<16x32xf32>
    %c8_i32 = arith.constant 8 : i32
    %75 = vector.broadcast %c8_i32 : i32 to vector<16x1xi32>
    %76 = arith.cmpi eq, %0, %75 : vector<16x1xi32>
    %77 = arith.extui %76 : vector<16x1xi1> to vector<16x1xi32>
    %78 = arith.sitofp %77 : vector<16x1xi32> to vector<16x1xf32>
    %79 = vector.extract_strided_slice %1 {offsets = [8, 0], sizes = [1, 32], strides = [1, 1]} : vector<16x32xf32> to vector<1x32xf32>
    %80 = vector.broadcast %78 : vector<16x1xf32> to vector<16x32xf32>
    %81 = vector.broadcast %79 : vector<1x32xf32> to vector<16x32xf32>
    %82 = arith.mulf %80, %81 : vector<16x32xf32>
    %83 = arith.addf %74, %82 : vector<16x32xf32>
    %c9_i32 = arith.constant 9 : i32
    %84 = vector.broadcast %c9_i32 : i32 to vector<16x1xi32>
    %85 = arith.cmpi eq, %0, %84 : vector<16x1xi32>
    %86 = arith.extui %85 : vector<16x1xi1> to vector<16x1xi32>
    %87 = arith.sitofp %86 : vector<16x1xi32> to vector<16x1xf32>
    %88 = vector.extract_strided_slice %1 {offsets = [9, 0], sizes = [1, 32], strides = [1, 1]} : vector<16x32xf32> to vector<1x32xf32>
    %89 = vector.broadcast %87 : vector<16x1xf32> to vector<16x32xf32>
    %90 = vector.broadcast %88 : vector<1x32xf32> to vector<16x32xf32>
    %91 = arith.mulf %89, %90 : vector<16x32xf32>
    %92 = arith.addf %83, %91 : vector<16x32xf32>
    %c10_i32 = arith.constant 10 : i32
    %93 = vector.broadcast %c10_i32 : i32 to vector<16x1xi32>
    %94 = arith.cmpi eq, %0, %93 : vector<16x1xi32>
    %95 = arith.extui %94 : vector<16x1xi1> to vector<16x1xi32>
    %96 = arith.sitofp %95 : vector<16x1xi32> to vector<16x1xf32>
    %97 = vector.extract_strided_slice %1 {offsets = [10, 0], sizes = [1, 32], strides = [1, 1]} : vector<16x32xf32> to vector<1x32xf32>
    %98 = vector.broadcast %96 : vector<16x1xf32> to vector<16x32xf32>
    %99 = vector.broadcast %97 : vector<1x32xf32> to vector<16x32xf32>
    %100 = arith.mulf %98, %99 : vector<16x32xf32>
    %101 = arith.addf %92, %100 : vector<16x32xf32>
    %c11_i32 = arith.constant 11 : i32
    %102 = vector.broadcast %c11_i32 : i32 to vector<16x1xi32>
    %103 = arith.cmpi eq, %0, %102 : vector<16x1xi32>
    %104 = arith.extui %103 : vector<16x1xi1> to vector<16x1xi32>
    %105 = arith.sitofp %104 : vector<16x1xi32> to vector<16x1xf32>
    %106 = vector.extract_strided_slice %1 {offsets = [11, 0], sizes = [1, 32], strides = [1, 1]} : vector<16x32xf32> to vector<1x32xf32>
    %107 = vector.broadcast %105 : vector<16x1xf32> to vector<16x32xf32>
    %108 = vector.broadcast %106 : vector<1x32xf32> to vector<16x32xf32>
    %109 = arith.mulf %107, %108 : vector<16x32xf32>
    %110 = arith.addf %101, %109 : vector<16x32xf32>
    %c12_i32 = arith.constant 12 : i32
    %111 = vector.broadcast %c12_i32 : i32 to vector<16x1xi32>
    %112 = arith.cmpi eq, %0, %111 : vector<16x1xi32>
    %113 = arith.extui %112 : vector<16x1xi1> to vector<16x1xi32>
    %114 = arith.sitofp %113 : vector<16x1xi32> to vector<16x1xf32>
    %115 = vector.extract_strided_slice %1 {offsets = [12, 0], sizes = [1, 32], strides = [1, 1]} : vector<16x32xf32> to vector<1x32xf32>
    %116 = vector.broadcast %114 : vector<16x1xf32> to vector<16x32xf32>
    %117 = vector.broadcast %115 : vector<1x32xf32> to vector<16x32xf32>
    %118 = arith.mulf %116, %117 : vector<16x32xf32>
    %119 = arith.addf %110, %118 : vector<16x32xf32>
    %c13_i32 = arith.constant 13 : i32
    %120 = vector.broadcast %c13_i32 : i32 to vector<16x1xi32>
    %121 = arith.cmpi eq, %0, %120 : vector<16x1xi32>
    %122 = arith.extui %121 : vector<16x1xi1> to vector<16x1xi32>
    %123 = arith.sitofp %122 : vector<16x1xi32> to vector<16x1xf32>
    %124 = vector.extract_strided_slice %1 {offsets = [13, 0], sizes = [1, 32], strides = [1, 1]} : vector<16x32xf32> to vector<1x32xf32>
    %125 = vector.broadcast %123 : vector<16x1xf32> to vector<16x32xf32>
    %126 = vector.broadcast %124 : vector<1x32xf32> to vector<16x32xf32>
    %127 = arith.mulf %125, %126 : vector<16x32xf32>
    %128 = arith.addf %119, %127 : vector<16x32xf32>
    %c14_i32 = arith.constant 14 : i32
    %129 = vector.broadcast %c14_i32 : i32 to vector<16x1xi32>
    %130 = arith.cmpi eq, %0, %129 : vector<16x1xi32>
    %131 = arith.extui %130 : vector<16x1xi1> to vector<16x1xi32>
    %132 = arith.sitofp %131 : vector<16x1xi32> to vector<16x1xf32>
    %133 = vector.extract_strided_slice %1 {offsets = [14, 0], sizes = [1, 32], strides = [1, 1]} : vector<16x32xf32> to vector<1x32xf32>
    %134 = vector.broadcast %132 : vector<16x1xf32> to vector<16x32xf32>
    %135 = vector.broadcast %133 : vector<1x32xf32> to vector<16x32xf32>
    %136 = arith.mulf %134, %135 : vector<16x32xf32>
    %137 = arith.addf %128, %136 : vector<16x32xf32>
    %c15_i32 = arith.constant 15 : i32
    %138 = vector.broadcast %c15_i32 : i32 to vector<16x1xi32>
    %139 = arith.cmpi eq, %0, %138 : vector<16x1xi32>
    %140 = arith.extui %139 : vector<16x1xi1> to vector<16x1xi32>
    %141 = arith.sitofp %140 : vector<16x1xi32> to vector<16x1xf32>
    %142 = vector.extract_strided_slice %1 {offsets = [15, 0], sizes = [1, 32], strides = [1, 1]} : vector<16x32xf32> to vector<1x32xf32>
    %143 = vector.broadcast %141 : vector<16x1xf32> to vector<16x32xf32>
    %144 = vector.broadcast %142 : vector<1x32xf32> to vector<16x32xf32>
    %145 = arith.mulf %143, %144 : vector<16x32xf32>
    %146 = arith.addf %137, %145 : vector<16x32xf32>
    %cst = arith.constant dense<0.000000e+00> : vector<16xf32>
    %147 = vector.multi_reduction <add>, %146, %cst [1] : vector<16x32xf32> to vector<16xf32>
    %148 = vector.shape_cast %147 : vector<16xf32> to vector<16x1xf32>
    %149 = arith.mulf %146, %146 : vector<16x32xf32>
    %cst_5 = arith.constant dense<0.000000e+00> : vector<16xf32>
    %150 = vector.multi_reduction <add>, %149, %cst_5 [1] : vector<16x32xf32> to vector<16xf32>
    %151 = vector.shape_cast %150 : vector<16xf32> to vector<16x1xf32>
    %cst_6 = arith.constant 3.125000e-02 : f32
    %152 = vector.broadcast %cst_6 : f32 to vector<16x1xf32>
    %153 = arith.mulf %148, %152 : vector<16x1xf32>
    %cst_7 = arith.constant 3.125000e-02 : f32
    %154 = vector.broadcast %cst_7 : f32 to vector<16x1xf32>
    %155 = arith.mulf %151, %154 : vector<16x1xf32>
    %156 = arith.mulf %153, %153 : vector<16x1xf32>
    %157 = arith.subf %155, %156 : vector<16x1xf32>
    %cst_8 = arith.constant 0.000000e+00 : f32
    %158 = vector.broadcast %cst_8 : f32 to vector<16x1xf32>
    %159 = arith.maximumf %157, %158 : vector<16x1xf32>
    %cst_9 = arith.constant 9.99999974E-6 : f32
    %160 = vector.broadcast %cst_9 : f32 to vector<16x1xf32>
    %161 = arith.addf %159, %160 : vector<16x1xf32>
    %162 = math.rsqrt %161 : vector<16x1xf32>
    %c0_10 = arith.constant 0 : index
    %c0_11 = arith.constant 0 : index
    %163 = vector.load %arg3[%c0_10, %c0_11] : memref<2x32xf32, #tpu.memory_space<vmem>>, vector<1x32xf32>
    %c1 = arith.constant 1 : index
    %c0_12 = arith.constant 0 : index
    %164 = vector.load %arg3[%c1, %c0_12] : memref<2x32xf32, #tpu.memory_space<vmem>>, vector<1x32xf32>
    %165 = vector.broadcast %153 : vector<16x1xf32> to vector<16x32xf32>
    %166 = arith.subf %146, %165 : vector<16x32xf32>
    %167 = vector.broadcast %162 : vector<16x1xf32> to vector<16x32xf32>
    %168 = arith.mulf %166, %167 : vector<16x32xf32>
    %169 = vector.broadcast %163 : vector<1x32xf32> to vector<16x32xf32>
    %170 = arith.mulf %168, %169 : vector<16x32xf32>
    %171 = vector.broadcast %164 : vector<1x32xf32> to vector<16x32xf32>
    %172 = arith.addf %170, %171 : vector<16x32xf32>
    %c0_13 = arith.constant 0 : index
    %c0_14 = arith.constant 0 : index
    %173 = vector.load %arg4[%c0_13, %c0_14] : memref<16x32xf32, #tpu.memory_space<vmem>>, vector<16x32xf32>
    tpu.vector_store %arg4[%c0_13, %c0_14], %172 {strides = array<i32>} : memref<16x32xf32, #tpu.memory_space<vmem>>, vector<16x32xf32>,
    return
  }
}

</mosaic_0001>

<bundles_post_ra>
// kernel: tpu_custom_call.1
= control target key start
LH: loop header
LB: loop body
LE: loop exit
PB: predicated region body
PF: predicated region fallthrough
CT: control target
= control target key end

     0   :  { %9 = vsyncpa [#allocation3], 0  ;;  %s867_s0 = inlined_call_operand.vmem [shape: s32[16,1], index: 0, kind: input, shape index: {}]   ;;  %s868_s1 = inlined_call_operand.vmem [shape: f32[16,32], index: 1, kind: input, shape index: {}]   ;;  %s869_s2 = inlined_call_operand.hbm [shape: f32[16,32], index: 2, kind: input, shape index: {}]   ;;  %s870_s3 = inlined_call_operand.vmem [shape: f32[2,32], index: 3, kind: input, shape index: {}]   ;;  %s871_s4 = inlined_call_operand.hbm [shape: f32[16,32], index: 4, kind: output, shape index: {}]  }
   0x1   :  { %10 = vsyncpa [#allocation4], 0  ;;  %s662_s15 = smov [#allocation2]   ;;  %s614_s19 = scalar_lea.hbm %s869_s2, 256 }
   0x2   :  { %s20_s16 = sshll.u32 %s662_s15, 4  ;;  %p615_p0 = scmp.ne.s32.totalorder %s869_s2, %s614_s19  ;;  %s21_s16 = int_to_ptr.vmem [resolvable:$true] %s20_s16 }
   0x3   :  { %p618_p1 = scmp.lt.u32.totalorder %s614_s19, %s869_s2 }
   0x5   :  { %p620_p2 = pnand %p618_p1, %p615_p0 }
   0x7   :  { %623 = shalt.err (!%p620_p2)
}
   0x8   :  { %s624_s24 = scalar_lea.vmem %s21_s16, 256  ;;  %p629_p4 = scmp.lt.s32.totalorder %s21_s16, %s21_s16 }
   0x9   :  { %p625_p3 = scmp.ne.s32.totalorder %s21_s16, %s624_s24  ;;  %p630_p5 = scmp.lt.s32.totalorder %s624_s24, %s624_s24 }
   0xb   :  { %p631_p6 = por %p630_p5, %p629_p4 }
   0xd   :  { %p632_p7 = pnand %p631_p6, %p625_p3 }
   0xf   :  { %635 = shalt.err (!%p632_p7)
}
  0x10   :  { %s663_s25 = smov 128   ;;  %s664_s26 = smov 8  }
  0x11   :  { %26 = dma.hbm_to_vmem [thread:$0]  %s869_s2, 256, %s21_s16, [#allocation3], %s663_s25, %s663_s25, %s664_s26  }
  0x12   :  { %658 = dma.done.wait [#allocation3], 256  }
  0x13   :  { %659 = vsyncadd [#allocation3], 4294967040  ;;  %v665_v0 = vmov 0   ;;  %v711_v1 = vld [vmem:[%s867_s0] sm:$0xff]  ;;  %v716_v2 = vld [vmem:[%s867_s0 + $0x8] sm:$0xff]  ;;  %v666_v3 = vmov 0.0   ;;  %v54_v52 = vlaneseq }
  0x14   :  { %539 = vset.pattern.permute.xlu1 %v665_v0  ;;  %528 = vset.pattern.permute.xlu0 %v665_v0  ;;  %vm86_vm0 = vcmp.eq.s32.totalorder %v711_v1, 2  ;;  %vm87_vm1 = vcmp.eq.s32.totalorder %v716_v2, 2  ;;  %vm38_vm2 = vcmp.eq.s32.totalorder %v711_v1, 0  ;;  %vm39_vm3 = vcmp.eq.s32.totalorder %v716_v2, 0  ;;  %v34_v55 = vld [vmem:[%s868_s1] sm:$0xff]  ;;  %s667_s12 = smov [#allocation5]  }
  0x15   :  { %v492_v4 = vsel %vm86_vm0, 1.0, %v666_v3  ;;  %v493_v5 = vsel %vm87_vm1, 1.0, %v666_v3  ;;  %v488_v6 = vsel %vm38_vm2, 1.0, %v666_v3  ;;  %v489_v7 = vsel %vm39_vm3, 1.0, %v666_v3  ;;  %s476_s13 = sshll.u32 %s667_s12, 4  ;;  %s477_s13 = int_to_ptr.vmem [resolvable:$true] %s476_s13 }
  0x16   :  { %v540_v8 = vpack.i.bf16 %v493_v5, %v492_v4  ;;  %v529_v9 = vpack.i.bf16 %v489_v7, %v488_v6  ;;  %vm110_vm4 = vcmp.eq.s32.totalorder %v711_v1, 3  ;;  %vm111_vm5 = vcmp.eq.s32.totalorder %v716_v2, 3  ;;  %s636_s14 = scalar_lea.vmem %s477_s13, 256  ;;  %p641_p9 = scmp.lt.s32.totalorder %s477_s13, %s477_s13 }
  0x17   :  { %v494_v10 = vsel %vm110_vm4, 1.0, %v666_v3  ;;  %v495_v11 = vsel %vm111_vm5, 1.0, %v666_v3  ;;  %vm62_vm6 = vcmp.eq.s32.totalorder %v711_v1, 1  ;;  %vm63_vm7 = vcmp.eq.s32.totalorder %v716_v2, 1  ;;  %p637_p8 = scmp.ne.s32.totalorder %s477_s13, %s636_s14  ;;  %p642_p10 = scmp.lt.s32.totalorder %s636_s14, %s636_s14 }
  0x18   :  { %541 = vperm.xlu1 %539, %v540_v8   ;;  %530 = vperm.xlu0 %528, %v529_v9   ;;  %v545_v12 = vpack.i.bf16 %v495_v11, %v494_v10  ;;  %v490_v13 = vsel %vm62_vm6, 1.0, %v666_v3  ;;  %v491_v14 = vsel %vm63_vm7, 1.0, %v666_v3  ;;  %vm158_vm8 = vcmp.eq.s32.totalorder %v711_v1, 5 }
  0x19   :  { %v534_v15 = vpack.i.bf16 %v491_v14, %v490_v13  ;;  %vm159_vm9 = vcmp.eq.s32.totalorder %v716_v2, 5  ;;  %v498_v16 = vsel %vm158_vm8, 1.0, %v666_v3  ;;  %vm134_vm10 = vcmp.eq.s32.totalorder %v711_v1, 4  ;;  %p643_p11 = por %p642_p10, %p641_p9 }
  0x1a   :  { %v499_v17 = vsel %vm159_vm9, 1.0, %v666_v3  ;;  %vm135_vm11 = vcmp.eq.s32.totalorder %v716_v2, 4  ;;  %v496_v18 = vsel %vm134_vm10, 1.0, %v666_v3  ;;  %vm206_vm12 = vcmp.eq.s32.totalorder %v711_v1, 7 }
  0x1b   :  { %v497_v19 = vsel %vm135_vm11, 1.0, %v666_v3  ;;  %vm207_vm13 = vcmp.eq.s32.totalorder %v716_v2, 7  ;;  %v555_v20 = vpack.i.bf16 %v499_v17, %v498_v16  ;;  %vm182_vm14 = vcmp.eq.s32.totalorder %v711_v1, 6  ;;  %p644_p12 = pnand %p643_p11, %p637_p8 }
  0x1c   :  { %546 = vperm.xlu1 %539, %v545_v12   ;;  %535 = vperm.xlu0 %528, %v534_v15   ;;  %v550_v21 = vpack.i.bf16 %v497_v19, %v496_v18  ;;  %vm183_vm15 = vcmp.eq.s32.totalorder %v716_v2, 6  ;;  %v502_v22 = vsel %vm206_vm12, 1.0, %v666_v3  ;;  %v503_v23 = vsel %vm207_vm13, 1.0, %v666_v3 }
  0x1d   :  { %v500_v24 = vsel %vm182_vm14, 1.0, %v666_v3  ;;  %v501_v25 = vsel %vm183_vm15, 1.0, %v666_v3  ;;  %vm254_vm0 = vcmp.eq.s32.totalorder %v711_v1, 9  ;;  %vm255_vm1 = vcmp.eq.s32.totalorder %v716_v2, 9 }
  0x1e   :  { %vm230_vm2 = vcmp.eq.s32.totalorder %v711_v1, 8  ;;  %vm231_vm3 = vcmp.eq.s32.totalorder %v716_v2, 8  ;;  %v565_v26 = vpack.i.bf16 %v503_v23, %v502_v22  ;;  %v560_v27 = vpack.i.bf16 %v501_v25, %v500_v24 }
  0x1f   :  { %v506_v28 = vsel %vm254_vm0, 1.0, %v666_v3  ;;  %v507_v29 = vsel %vm255_vm1, 1.0, %v666_v3  ;;  %v504_v30 = vsel %vm230_vm2, 1.0, %v666_v3  ;;  %v505_v31 = vsel %vm231_vm3, 1.0, %v666_v3 }
  0x20   :  { %556 = vperm.xlu1 %539, %v555_v20   ;;  %551 = vperm.xlu0 %528, %v550_v21   ;;  %vm302_vm4 = vcmp.eq.s32.totalorder %v711_v1, 11  ;;  %vm303_vm5 = vcmp.eq.s32.totalorder %v716_v2, 11  ;;  %vm278_vm6 = vcmp.eq.s32.totalorder %v711_v1, 10  ;;  %vm279_vm7 = vcmp.eq.s32.totalorder %v716_v2, 10 }
  0x21   :  { %v575_v32 = vpack.i.bf16 %v507_v29, %v506_v28  ;;  %v570_v33 = vpack.i.bf16 %v505_v31, %v504_v30  ;;  %v510_v34 = vsel %vm302_vm4, 1.0, %v666_v3  ;;  %v511_v35 = vsel %vm303_vm5, 1.0, %v666_v3 }
  0x22   :  { %v508_v36 = vsel %vm278_vm6, 1.0, %v666_v3  ;;  %v509_v37 = vsel %vm279_vm7, 1.0, %v666_v3  ;;  %vm350_vm8 = vcmp.eq.s32.totalorder %v711_v1, 13  ;;  %vm351_vm9 = vcmp.eq.s32.totalorder %v716_v2, 13 }
  0x23   :  { %vm326_vm10 = vcmp.eq.s32.totalorder %v711_v1, 12  ;;  %vm327_vm11 = vcmp.eq.s32.totalorder %v716_v2, 12  ;;  %v585_v38 = vpack.i.bf16 %v511_v35, %v510_v34  ;;  %v580_v39 = vpack.i.bf16 %v509_v37, %v508_v36 }
  0x24   :  { %566 = vperm.xlu1 %539, %v565_v26   ;;  %561 = vperm.xlu0 %528, %v560_v27   ;;  %v514_v40 = vsel %vm350_vm8, 1.0, %v666_v3  ;;  %v515_v41 = vsel %vm351_vm9, 1.0, %v666_v3  ;;  %v512_v42 = vsel %vm326_vm10, 1.0, %v666_v3  ;;  %v513_v43 = vsel %vm327_vm11, 1.0, %v666_v3 }
  0x25   :  { %vm398_vm12 = vcmp.eq.s32.totalorder %v711_v1, 15  ;;  %vm399_vm13 = vcmp.eq.s32.totalorder %v716_v2, 15  ;;  %vm374_vm14 = vcmp.eq.s32.totalorder %v711_v1, 14  ;;  %vm375_vm15 = vcmp.eq.s32.totalorder %v716_v2, 14  ;;  %v36_v2 = vld [vmem:[#allocation2] sm:$0xff] }
  0x26   :  { %v595_v44 = vpack.i.bf16 %v515_v41, %v514_v40  ;;  %v590_v45 = vpack.i.bf16 %v513_v43, %v512_v42  ;;  %v518_v46 = vsel %vm398_vm12, 1.0, %v666_v3  ;;  %v519_v47 = vsel %vm399_vm13, 1.0, %v666_v3 }
  0x27   :  { %v516_v48 = vsel %vm374_vm14, 1.0, %v666_v3  ;;  %v517_v49 = vsel %vm375_vm15, 1.0, %v666_v3  ;;  %v605_v50 = vpack.i.bf16 %v519_v47, %v518_v46  ;;  %v782_v53 = vshrl.u32 %v54_v52, 7  ;;  %v37_v3 = vld [vmem:[#allocation2 + $0x8] sm:$0xff] }
  0x28   :  { %576 = vperm.xlu1 %539, %v575_v32   ;;  %571 = vperm.xlu0 %528, %v570_v33   ;;  %v600_v51 = vpack.i.bf16 %v517_v49, %v516_v48  ;;  %v812_v48 = vld [vmem:[%s868_s1 + $0x8] sm:$0xff]  ;;  %vm422_vm0 = vcmask 261120  }
  0x29   :  { %v56_v54 = vsub.s32 0, %v782_v53  ;;  %v80_v59 = vsub.s32 1, %v782_v53  ;;  %v104_v60 = vsub.s32 2, %v782_v53  ;;  %v128_v1 = vsub.s32 3, %v782_v53 }
  0x2a   :  { %v152_v8 = vsub.s32 4, %v782_v53  ;;  %v176_v16 = vsub.s32 5, %v782_v53  ;;  %v200_v26 = vsub.s32 6, %v782_v53  ;;  %v224_v34 = vsub.s32 7, %v782_v53 }
  0x2b   :  { %v57_v56 = vrot.slane %v34_v55, %v56_v54  ;;  %v81_v5 = vrot.slane %v34_v55, %v80_v59  ;;  %v105_v7 = vrot.slane %v34_v55, %v104_v60  ;;  %v129_v15 = vrot.slane %v34_v55, %v128_v1 }
  0x2c   :  { %586 = vperm.xlu1 %539, %v585_v38   ;;  %581 = vperm.xlu0 %528, %v580_v39   ;;  %v153_v23 = vrot.slane %v34_v55, %v152_v8  ;;  %v177_v31 = vrot.slane %v34_v55, %v176_v16  ;;  %v201_v43 = vrot.slane %v34_v55, %v200_v26 }
  0x30   :  { %596 = vperm.xlu1 %539, %v595_v44   ;;  %591 = vperm.xlu0 %528, %v590_v45  }
  0x34   :  { %606 = vperm.xlu1 %539, %v605_v50   ;;  %601 = vperm.xlu0 %528, %v600_v51   ;;  %v225_v51 = vrot.slane %v34_v55, %v224_v34  ;;  %v273_v55 = vrot.slane %v812_v48, %v80_v59 }
  0x97   :  { %v542_v57 = vpop.permute.xlu1 %541  ;;  %v531_v58 = vpop.permute.xlu0 %530 }
  0x98   :  { %v533_v61 = vunpack.i.h.bf16 %v531_v58  ;;  %v532_v62 = vunpack.i.l.bf16 %v531_v58  ;;  %v544_v9 = vunpack.i.h.bf16 %v542_v57  ;;  %v543_v10 = vunpack.i.l.bf16 %v542_v57 }
  0x9a   :  { %v59_v63 = vmul.f32 %v533_v61, %v57_v56  ;;  %v58_v0 = vmul.f32 %v532_v62, %v57_v56  ;;  %v107_v27 = vmul.f32 %v544_v9, %v105_v7  ;;  %v106_v28 = vmul.f32 %v543_v10, %v105_v7 }
  0x9b   :  { %v547_v4 = vpop.permute.xlu1 %546  ;;  %v536_v6 = vpop.permute.xlu0 %535 }
  0x9c   :  { %v538_v11 = vunpack.i.h.bf16 %v536_v6  ;;  %v537_v12 = vunpack.i.l.bf16 %v536_v6  ;;  %v61_v13 = vadd.f32 %v59_v63, %v37_v3  ;;  %v60_v14 = vadd.f32 %v58_v0, %v36_v2 }
  0x9d   :  { %v549_v17 = vunpack.i.h.bf16 %v547_v4  ;;  %v548_v18 = vunpack.i.l.bf16 %v547_v4  ;;  %v249_v63 = vrot.slane %v812_v48, %v56_v54 }
  0x9e   :  { %v83_v19 = vmul.f32 %v538_v11, %v81_v5  ;;  %v82_v20 = vmul.f32 %v537_v12, %v81_v5 }
  0x9f   :  { %v557_v21 = vpop.permute.xlu1 %556  ;;  %v552_v22 = vpop.permute.xlu0 %551  ;;  %v131_v35 = vmul.f32 %v549_v17, %v129_v15  ;;  %v130_v36 = vmul.f32 %v548_v18, %v129_v15  ;;  %v297_v18 = vrot.slane %v812_v48, %v104_v60  ;;  %v345_v60 = vrot.slane %v812_v48, %v152_v8 }
  0xa0   :  { %v554_v24 = vunpack.i.h.bf16 %v552_v22  ;;  %v553_v25 = vunpack.i.l.bf16 %v552_v22  ;;  %v84_v29 = vadd.f32 %v82_v20, %v60_v14  ;;  %v85_v30 = vadd.f32 %v83_v19, %v61_v13 }
  0xa1   :  { %v559_v32 = vunpack.i.h.bf16 %v557_v21  ;;  %v558_v33 = vunpack.i.l.bf16 %v557_v21 }
  0xa2   :  { %v108_v37 = vadd.f32 %v106_v28, %v84_v29  ;;  %v109_v38 = vadd.f32 %v107_v27, %v85_v30  ;;  %v155_v41 = vmul.f32 %v554_v24, %v153_v23  ;;  %v154_v42 = vmul.f32 %v553_v25, %v153_v23 }
  0xa3   :  { %v567_v39 = vpop.permute.xlu1 %566  ;;  %v562_v40 = vpop.permute.xlu0 %561  ;;  %v179_v49 = vmul.f32 %v559_v32, %v177_v31  ;;  %v178_v50 = vmul.f32 %v558_v33, %v177_v31  ;;  %v321_v24 = vrot.slane %v812_v48, %v128_v1  ;;  %v369_v1 = vrot.slane %v812_v48, %v176_v16 }
  0xa4   :  { %v132_v44 = vadd.f32 %v130_v36, %v108_v37  ;;  %v133_v45 = vadd.f32 %v131_v35, %v109_v38  ;;  %v564_v46 = vunpack.i.h.bf16 %v562_v40  ;;  %v563_v47 = vunpack.i.l.bf16 %v562_v40 }
  0xa5   :  { %v569_v57 = vunpack.i.h.bf16 %v567_v39  ;;  %v568_v58 = vunpack.i.l.bf16 %v567_v39 }
  0xa6   :  { %v156_v52 = vadd.f32 %v154_v42, %v132_v44  ;;  %v157_v56 = vadd.f32 %v155_v41, %v133_v45  ;;  %v203_v3 = vmul.f32 %v564_v46, %v201_v43  ;;  %v202_v6 = vmul.f32 %v563_v47, %v201_v43 }
  0xa7   :  { %v577_v61 = vpop.permute.xlu1 %576  ;;  %v572_v62 = vpop.permute.xlu0 %571  ;;  %v227_v10 = vmul.f32 %v569_v57, %v225_v51  ;;  %v226_v11 = vmul.f32 %v568_v58, %v225_v51  ;;  %v417_v58 = vrot.slane %v812_v48, %v224_v34 }
  0xa8   :  { %v574_v0 = vunpack.i.h.bf16 %v572_v62  ;;  %v573_v2 = vunpack.i.l.bf16 %v572_v62  ;;  %v180_v4 = vadd.f32 %v178_v50, %v156_v52  ;;  %v181_v5 = vadd.f32 %v179_v49, %v157_v56 }
  0xa9   :  { %v579_v7 = vunpack.i.h.bf16 %v577_v61  ;;  %v578_v9 = vunpack.i.l.bf16 %v577_v61  ;;  %v393_v49 = vrot.slane %v812_v48, %v200_v26 }
  0xaa   :  { %v204_v12 = vadd.f32 %v202_v6, %v180_v4  ;;  %v205_v13 = vadd.f32 %v203_v3, %v181_v5  ;;  %v251_v17 = vmul.f32 %v574_v0, %v249_v63  ;;  %v250_v54 = vmul.f32 %v573_v2, %v249_v63 }
  0xab   :  { %v587_v14 = vpop.permute.xlu1 %586  ;;  %v582_v15 = vpop.permute.xlu0 %581  ;;  %v275_v23 = vmul.f32 %v579_v7, %v273_v55  ;;  %v274_v59 = vmul.f32 %v578_v9, %v273_v55 }
  0xac   :  { %v228_v19 = vadd.f32 %v226_v11, %v204_v12  ;;  %v229_v20 = vadd.f32 %v227_v10, %v205_v13  ;;  %v584_v21 = vunpack.i.h.bf16 %v582_v15  ;;  %v583_v22 = vunpack.i.l.bf16 %v582_v15 }
  0xad   :  { %v589_v28 = vunpack.i.h.bf16 %v587_v14  ;;  %v588_v29 = vunpack.i.l.bf16 %v587_v14 }
  0xae   :  { %v252_v25 = vadd.f32 %v250_v54, %v228_v19  ;;  %v253_v27 = vadd.f32 %v251_v17, %v229_v20  ;;  %v299_v35 = vmul.f32 %v584_v21, %v297_v18  ;;  %v298_v38 = vmul.f32 %v583_v22, %v297_v18 }
  0xaf   :  { %v597_v30 = vpop.permute.xlu1 %596  ;;  %v592_v31 = vpop.permute.xlu0 %591  ;;  %v323_v41 = vmul.f32 %v589_v28, %v321_v24  ;;  %v322_v42 = vmul.f32 %v588_v29, %v321_v24 }
  0xb0   :  { %v594_v32 = vunpack.i.h.bf16 %v592_v31  ;;  %v593_v33 = vunpack.i.l.bf16 %v592_v31  ;;  %v276_v36 = vadd.f32 %v274_v59, %v252_v25  ;;  %v277_v37 = vadd.f32 %v275_v23, %v253_v27 }
  0xb1   :  { %v599_v39 = vunpack.i.h.bf16 %v597_v30  ;;  %v598_v40 = vunpack.i.l.bf16 %v597_v30 }
  0xb2   :  { %v300_v43 = vadd.f32 %v298_v38, %v276_v36  ;;  %v301_v44 = vadd.f32 %v299_v35, %v277_v37  ;;  %v347_v46 = vmul.f32 %v594_v32, %v345_v60  ;;  %v346_v47 = vmul.f32 %v593_v33, %v345_v60  ;;  %v520_v60 = vld [vmem:[%s870_s3] ss:$0 sm:$0xff]  ;;  %v521_v33 = vld [vmem:[%s870_s3 + $0x1] ss:$0 sm:$0xff] }
  0xb3   :  { %v602_v45 = vpop.permute.xlu0 %601  ;;  %v607_v8 = vpop.permute.xlu1 %606  ;;  %v371_v57 = vmul.f32 %v599_v39, %v369_v1  ;;  %v370_v16 = vmul.f32 %v598_v40, %v369_v1 }
  0xb4   :  { %v324_v50 = vadd.f32 %v322_v42, %v300_v43  ;;  %v325_v51 = vadd.f32 %v323_v41, %v301_v44  ;;  %v604_v52 = vunpack.i.h.bf16 %v602_v45  ;;  %v603_v56 = vunpack.i.l.bf16 %v602_v45 }
  0xb5   :  { %v609_v63 = vunpack.i.h.bf16 %v607_v8  ;;  %v608_v0 = vunpack.i.l.bf16 %v607_v8 }
  0xb6   :  { %v348_v61 = vadd.f32 %v346_v47, %v324_v50  ;;  %v349_v62 = vadd.f32 %v347_v46, %v325_v51  ;;  %v395_v2 = vmul.f32 %v604_v52, %v393_v49  ;;  %v394_v5 = vmul.f32 %v603_v56, %v393_v49 }
  0xb7   :  { %v419_v6 = vmul.f32 %v609_v63, %v417_v58  ;;  %v418_v26 = vmul.f32 %v608_v0, %v417_v58 }
  0xb8   :  { %v372_v3 = vadd.f32 %v370_v16, %v348_v61  ;;  %v373_v4 = vadd.f32 %v371_v57, %v349_v62 }
  0xba   :  { %v396_v55 = vadd.f32 %v394_v5, %v372_v3  ;;  %v397_v7 = vadd.f32 %v395_v2, %v373_v4 }
  0xbc   :  { %v421_v9 = vadd.f32 %v419_v6, %v397_v7  ;;  %v420_v10 = vadd.f32 %v418_v26, %v396_v55 }
  0xbe   :  { %v426_v11 = vsel %vm422_vm0, %v421_v9, 0.0  ;;  %v423_v53 = vsel %vm422_vm0, %v420_v10, 0.0  ;;  %v429_v34 = vmul.f32 %v420_v10, %v420_v10  ;;  %v430_v12 = vmul.f32 %v421_v9, %v421_v9 }
  0xbf   :  { %427 = vadd.xlane.f32.xlu1 %v426_v11  ;;  %424 = vadd.xlane.f32.xlu0 %v423_v53 }
  0xc0   :  { %v431_v48 = vsel %vm422_vm0, %v429_v34, 0.0  ;;  %v434_v13 = vsel %vm422_vm0, %v430_v12, 0.0 }
  0xc3   :  { %432 = vadd.xlane.f32.xlu0 %v431_v48 }
  0xc7   :  { %435 = vadd.xlane.f32.xlu0 %v434_v13 }
 0x14c   :  { %v425_v14 = vpop.xlane.xlu0 %424  ;;  %v428_v17 = vpop.xlane.xlu1 %427 }
 0x14d   :  { %v437_v15 = vmul.f32 0.03125, %v425_v14  ;;  %v438_v18 = vmul.f32 0.03125, %v428_v17 }
 0x14f   :  { %v441_v19 = vmul.f32 %v437_v15, %v437_v15  ;;  %v442_v23 = vmul.f32 %v438_v18, %v438_v18  ;;  %v453_v30 = vsub.f32 %v420_v10, %v437_v15  ;;  %v454_v35 = vsub.f32 %v421_v9, %v438_v18 }
 0x150   :  { %v433_v54 = vpop.xlane.xlu0 %432 }
 0x151   :  { %v439_v20 = vmul.f32 0.03125, %v433_v54 }
 0x153   :  { %v443_v21 = vsub.f32 %v439_v20, %v441_v19 }
 0x154   :  { %v436_v22 = vpop.xlane.xlu0 %435 }
 0x155   :  { %v445_v59 = vmax.f32 %v443_v21, 0.0  ;;  %v440_v24 = vmul.f32 0.03125, %v436_v22 }
 0x157   :  { %v447_v25 = vadd.f32 1e-05, %v445_v59  ;;  %v444_v27 = vsub.f32 %v440_v24, %v442_v23 }
 0x159   :  { %610 = vrsqrt.f32 %v447_v25  ;;  %v446_v28 = vmax.f32 %v444_v27, 0.0 }
 0x15b   :  { %v448_v29 = vadd.f32 1e-05, %v446_v28 }
 0x15d   :  { %612 = vrsqrt.f32 %v448_v29 }
 0x163   :  { %v611_v31 = vpop.eup %610 }
 0x164   :  { %v455_v32 = vmul.f32 %v611_v31, %v453_v30 }
 0x166   :  { %v461_v36 = vmul.f32 %v520_v60, %v455_v32 }
 0x167   :  { %v613_v37 = vpop.eup %612 }
 0x168   :  { %v456_v38 = vmul.f32 %v613_v37, %v454_v35  ;;  %v467_v1 = vadd.f32 %v521_v33, %v461_v36 }
 0x16a   :  { %v462_v39 = vmul.f32 %v520_v60, %v456_v38  ;;  %469 = vst.msk [vmem:[#allocation5] sm:$0xff] %vm422_vm0, %v467_v1 }
 0x16c   :  { %v468_v40 = vadd.f32 %v521_v33, %v462_v39 }
 0x16e   :  { %470 = vst.msk [vmem:[#allocation5 + $0x8] sm:$0xff] %vm422_vm0, %v468_v40 }
 0x16f   :  { %647 = shalt.err (!%p644_p12)
}
 0x170   :  { %s648_s16 = scalar_lea.hbm %s871_s4, 256 }
 0x171   :  { %p649_p13 = scmp.ne.s32.totalorder %s871_s4, %s648_s16  ;;  %p652_p0 = scmp.lt.u32.totalorder %s648_s16, %s871_s4 }
 0x173   :  { %p654_p1 = pnand %p652_p0, %p649_p13 }
 0x175   :  { %657 = shalt.err (!%p654_p1)
}
 0x176   :  { %482 = dma.vmem_to_hbm [thread:$0]  %s477_s13, 256, %s871_s4, [#allocation4], %s663_s25, %s663_s25, %s664_s26  }
 0x177   :  { %660 = dma.done.wait [#allocation4], 256  }
 0x178   :  { %661 = vsyncadd [#allocation4], 4294967040 }
 0x179   :  { %486 = vsyncpa [#allocation3], 1 }
 0x17a   :  { %487 = vsyncpa [#allocation4], 1 }

</bundles_post_ra>
